<compile_context>
chip_gen: v7x
topology: tpu7x:2x2x1
jax: 0.10.0
libtpu: 0.0.40
codegen_flags: <defaults>
</compile_context>

<pallas_src>
import jax
import jax.numpy as jnp
from jax.experimental import pallas as pl
from jax.experimental.pallas import tpu as pltpu  # noqa: F401  (TPU backend)

EPS = 1e-5


def _mlp_bn_kernel(x_ref, w1_ref, v1_ref, w2_ref, v2_ref, o_ref):
    x = x_ref[...]                                              # (B, 7)

    # ---- layer 1: Linear(7,64) + folded BatchNorm1d(64) + ReLU ----
    h = jnp.dot(x, w1_ref[...], preferred_element_type=jnp.float32)
    h = h + v1_ref[0:1, :]                                      # + b1
    mu = jnp.mean(h, axis=0, keepdims=True)                     # (1, 64)
    var = jnp.mean((h - mu) * (h - mu), axis=0, keepdims=True)  # biased var
    a = v1_ref[1:2, :] * jax.lax.rsqrt(var + EPS)               # g1 * rsqrt
    c = v1_ref[2:3, :] - mu * a                                 # be1 - mu*a
    h = jnp.maximum(h * a + c, 0.0)                             # (B, 64)

    # ---- layer 2: Linear(64,256) + folded BatchNorm1d(256) + ReLU ----
    h = jnp.dot(h, w2_ref[...], preferred_element_type=jnp.float32)
    h = h + v2_ref[0:1, :]                                      # + b2
    mu = jnp.mean(h, axis=0, keepdims=True)                     # (1, 256)
    var = jnp.mean((h - mu) * (h - mu), axis=0, keepdims=True)
    a = v2_ref[1:2, :] * jax.lax.rsqrt(var + EPS)               # g2 * rsqrt
    c = v2_ref[2:3, :] - mu * a                                 # be2 - mu*a
    h = jnp.maximum(h * a + c, 0.0)                             # (B, 256)

    # ---- layer 3: Linear(256,1) as w3 @ h^T -> (1, B) lane-dense output ----
    w3 = v2_ref[3:4, :]                                         # (1, 256)
    out = jax.lax.dot_general(
        w3, h, (((1,), (1,)), ((), ())),
        preferred_element_type=jnp.float32)                     # (1, B)
    out = out + v2_ref[4:5, 0:1]                                # + b3 (scalar bcast)
    o_ref[...] = out.astype(o_ref.dtype)


def pack_params(p):
    """Pack per-feature vectors + final layer into two lane-dense slabs."""
    v1 = jnp.concatenate([p["b1"], p["g1"], p["be1"]], axis=0)          # (3, 64)
    b3_row = jnp.zeros((1, 256), jnp.float32).at[0, 0].set(p["b3"][0, 0])
    v2 = jnp.concatenate(
        [p["b2"], p["g2"], p["be2"], p["w3"], b3_row], axis=0)          # (5, 256)
    return p["w1"], v1, p["w2"], v2


def mlp_bn_forward(x, packed):
    """x: (B, 7) float32.  packed: output of pack_params.  Returns (B, 1)."""
    B = x.shape[0]
    w1, v1, w2, v2 = packed
    args = (x, w1, v1, w2, v2)
    # All inputs are 2-D; full-array blocks, single grid step.
    in_specs = [pl.BlockSpec(a.shape, lambda: (0, 0)) for a in args]
    out = pl.pallas_call(
        _mlp_bn_kernel,
        out_shape=jax.ShapeDtypeStruct((1, B), jnp.float32),
        grid=(),
        in_specs=in_specs,
        out_specs=pl.BlockSpec((1, B), lambda: (0, 0)),
    )(*args)
    return out.T                                                # (B, 1)


def init_params(key):
    """Deterministic init matching the PyTorch module's shapes.
    Linear weights stored as (in, out); w3 stored as a (1, 256) row."""
    ks = jax.random.split(key, 6)

    def linear(kw, kb, fan_in, fan_out):
        bound = 1.0 / jnp.sqrt(fan_in)
        w = jax.random.uniform(kw, (fan_in, fan_out), jnp.float32, -bound, bound)
        b = jax.random.uniform(kb, (1, fan_out), jnp.float32, -bound, bound)
        return w, b

    w1, b1 = linear(ks[0], ks[1], 7, 64)
    w2, b2 = linear(ks[2], ks[3], 64, 256)
    w3c, b3 = linear(ks[4], ks[5], 256, 1)       # (256,1), (1,1)
    w3 = w3c.T                                   # store as (1, 256)
    g1, be1 = jnp.ones((1, 64), jnp.float32), jnp.zeros((1, 64), jnp.float32)
    g2, be2 = jnp.ones((1, 256), jnp.float32), jnp.zeros((1, 256), jnp.float32)
    return dict(w1=w1, b1=b1, g1=g1, be1=be1,
                w2=w2, b2=b2, g2=g2, be2=be2,
                w3=w3, b3=b3)


def _reference(x, p):
    """Pure-JAX reference with PyTorch train-mode BN semantics."""
    h = x @ p["w1"] + p["b1"]
    mu = h.mean(0, keepdims=True); var = ((h - mu) ** 2).mean(0, keepdims=True)
    h = jnp.maximum((h - mu) / jnp.sqrt(var + EPS) * p["g1"] + p["be1"], 0.0)
    h = h @ p["w2"] + p["b2"]
    mu = h.mean(0, keepdims=True); var = ((h - mu) ** 2).mean(0, keepdims=True)
    h = jnp.maximum((h - mu) / jnp.sqrt(var + EPS) * p["g2"] + p["be2"], 0.0)
    return h @ p["w3"].T + p["b3"]


if __name__ == "__main__":
    key = jax.random.PRNGKey(0)
    kx, kp = jax.random.split(key)
    B = 8
    x = jax.random.normal(kx, (B, 7), jnp.float32)
    params = init_params(kp)
    packed = pack_params(params)

    out = mlp_bn_forward(x, packed)
    out = jax.block_until_ready(out)

    ref = _reference(x, params)
    assert out.shape == (B, 1)
    assert jnp.allclose(out, ref, atol=1e-4, rtol=1e-4), "mismatch vs reference"
    print("KERNEL_OK")
</pallas_src>

<mosaic_0001>
module attributes {stable_mosaic.version = 11 : i64} {
  func.func @_mlp_bn_kernel(%arg0: memref<8x7xf32, #tpu.memory_space<vmem>>, %arg1: memref<7x64xf32, #tpu.memory_space<vmem>>, %arg2: memref<3x64xf32, #tpu.memory_space<vmem>>, %arg3: memref<64x256xf32, #tpu.memory_space<vmem>>, %arg4: memref<5x256xf32, #tpu.memory_space<vmem>>, %arg5: memref<1x8xf32, #tpu.memory_space<vmem>>) attributes {dimension_semantics = [], scalar_prefetch = 0 : i64, scratch_operands = 0 : i64, tpu.core_type = #tpu.core_type<tc>} {
    %c0 = arith.constant 0 : index
    %c0_0 = arith.constant 0 : index
    %0 = vector.load %arg0[%c0, %c0_0] : memref<8x7xf32, #tpu.memory_space<vmem>>, vector<8x7xf32>
    %c0_1 = arith.constant 0 : index
    %c0_2 = arith.constant 0 : index
    %1 = vector.load %arg1[%c0_1, %c0_2] : memref<7x64xf32, #tpu.memory_space<vmem>>, vector<7x64xf32>
    %cst = arith.constant dense<0.000000e+00> : vector<8x64xf32>
    %2 = tpu.matmul %0, %1, %cst {dimension_numbers = #tpu.dot_dimension_numbers<[1], [0], [0], [1], [0, 0, 1, 1], [], []>} : vector<8x7xf32>, vector<7x64xf32>, vector<8x64xf32> -> vector<8x64xf32>
    %c0_3 = arith.constant 0 : index
    %c0_4 = arith.constant 0 : index
    %3 = vector.load %arg2[%c0_3, %c0_4] : memref<3x64xf32, #tpu.memory_space<vmem>>, vector<1x64xf32>
    %4 = vector.broadcast %3 : vector<1x64xf32> to vector<8x64xf32>
    %5 = arith.addf %2, %4 : vector<8x64xf32>
    %cst_5 = arith.constant dense<0.000000e+00> : vector<64xf32>
    %6 = vector.multi_reduction <add>, %5, %cst_5 [0] : vector<8x64xf32> to vector<64xf32>
    %7 = vector.shape_cast %6 : vector<64xf32> to vector<1x64xf32>
    %cst_6 = arith.constant 8.000000e+00 : f32
    %8 = vector.broadcast %cst_6 : f32 to vector<1x64xf32>
    %9 = arith.divf %7, %8 : vector<1x64xf32>
    %10 = vector.broadcast %9 : vector<1x64xf32> to vector<8x64xf32>
    %11 = arith.subf %5, %10 : vector<8x64xf32>
    %12 = vector.broadcast %9 : vector<1x64xf32> to vector<8x64xf32>
    %13 = arith.subf %5, %12 : vector<8x64xf32>
    %14 = arith.mulf %11, %13 : vector<8x64xf32>
    %cst_7 = arith.constant dense<0.000000e+00> : vector<64xf32>
    %15 = vector.multi_reduction <add>, %14, %cst_7 [0] : vector<8x64xf32> to vector<64xf32>
    %16 = vector.shape_cast %15 : vector<64xf32> to vector<1x64xf32>
    %cst_8 = arith.constant 8.000000e+00 : f32
    %17 = vector.broadcast %cst_8 : f32 to vector<1x64xf32>
    %18 = arith.divf %16, %17 : vector<1x64xf32>
    %c1 = arith.constant 1 : index
    %c0_9 = arith.constant 0 : index
    %19 = vector.load %arg2[%c1, %c0_9] : memref<3x64xf32, #tpu.memory_space<vmem>>, vector<1x64xf32>
    %cst_10 = arith.constant 9.99999974E-6 : f32
    %20 = vector.broadcast %cst_10 : f32 to vector<1x64xf32>
    %21 = arith.addf %18, %20 : vector<1x64xf32>
    %22 = math.rsqrt %21 : vector<1x64xf32>
    %23 = arith.mulf %19, %22 : vector<1x64xf32>
    %c2 = arith.constant 2 : index
    %c0_11 = arith.constant 0 : index
    %24 = vector.load %arg2[%c2, %c0_11] : memref<3x64xf32, #tpu.memory_space<vmem>>, vector<1x64xf32>
    %25 = arith.mulf %9, %23 : vector<1x64xf32>
    %26 = arith.subf %24, %25 : vector<1x64xf32>
    %27 = vector.broadcast %23 : vector<1x64xf32> to vector<8x64xf32>
    %28 = arith.mulf %5, %27 : vector<8x64xf32>
    %29 = vector.broadcast %26 : vector<1x64xf32> to vector<8x64xf32>
    %30 = arith.addf %28, %29 : vector<8x64xf32>
    %cst_12 = arith.constant 0.000000e+00 : f32
    %31 = vector.broadcast %cst_12 : f32 to vector<8x64xf32>
    %32 = arith.maximumf %30, %31 : vector<8x64xf32>
    %c0_13 = arith.constant 0 : index
    %c0_14 = arith.constant 0 : index
    %33 = vector.load %arg3[%c0_13, %c0_14] : memref<64x256xf32, #tpu.memory_space<vmem>>, vector<64x256xf32>
    %cst_15 = arith.constant dense<0.000000e+00> : vector<8x256xf32>
    %34 = tpu.matmul %32, %33, %cst_15 {dimension_numbers = #tpu.dot_dimension_numbers<[1], [0], [0], [1], [0, 0, 1, 1], [], []>} : vector<8x64xf32>, vector<64x256xf32>, vector<8x256xf32> -> vector<8x256xf32>
    %c0_16 = arith.constant 0 : index
    %c0_17 = arith.constant 0 : index
    %35 = vector.load %arg4[%c0_16, %c0_17] : memref<5x256xf32, #tpu.memory_space<vmem>>, vector<1x256xf32>
    %36 = vector.broadcast %35 : vector<1x256xf32> to vector<8x256xf32>
    %37 = arith.addf %34, %36 : vector<8x256xf32>
    %cst_18 = arith.constant dense<0.000000e+00> : vector<256xf32>
    %38 = vector.multi_reduction <add>, %37, %cst_18 [0] : vector<8x256xf32> to vector<256xf32>
    %39 = vector.shape_cast %38 : vector<256xf32> to vector<1x256xf32>
    %cst_19 = arith.constant 8.000000e+00 : f32
    %40 = vector.broadcast %cst_19 : f32 to vector<1x256xf32>
    %41 = arith.divf %39, %40 : vector<1x256xf32>
    %42 = vector.broadcast %41 : vector<1x256xf32> to vector<8x256xf32>
    %43 = arith.subf %37, %42 : vector<8x256xf32>
    %44 = vector.broadcast %41 : vector<1x256xf32> to vector<8x256xf32>
    %45 = arith.subf %37, %44 : vector<8x256xf32>
    %46 = arith.mulf %43, %45 : vector<8x256xf32>
    %cst_20 = arith.constant dense<0.000000e+00> : vector<256xf32>
    %47 = vector.multi_reduction <add>, %46, %cst_20 [0] : vector<8x256xf32> to vector<256xf32>
    %48 = vector.shape_cast %47 : vector<256xf32> to vector<1x256xf32>
    %cst_21 = arith.constant 8.000000e+00 : f32
    %49 = vector.broadcast %cst_21 : f32 to vector<1x256xf32>
    %50 = arith.divf %48, %49 : vector<1x256xf32>
    %c1_22 = arith.constant 1 : index
    %c0_23 = arith.constant 0 : index
    %51 = vector.load %arg4[%c1_22, %c0_23] : memref<5x256xf32, #tpu.memory_space<vmem>>, vector<1x256xf32>
    %cst_24 = arith.constant 9.99999974E-6 : f32
    %52 = vector.broadcast %cst_24 : f32 to vector<1x256xf32>
    %53 = arith.addf %50, %52 : vector<1x256xf32>
    %54 = math.rsqrt %53 : vector<1x256xf32>
    %55 = arith.mulf %51, %54 : vector<1x256xf32>
    %c2_25 = arith.constant 2 : index
    %c0_26 = arith.constant 0 : index
    %56 = vector.load %arg4[%c2_25, %c0_26] : memref<5x256xf32, #tpu.memory_space<vmem>>, vector<1x256xf32>
    %57 = arith.mulf %41, %55 : vector<1x256xf32>
    %58 = arith.subf %56, %57 : vector<1x256xf32>
    %59 = vector.broadcast %55 : vector<1x256xf32> to vector<8x256xf32>
    %60 = arith.mulf %37, %59 : vector<8x256xf32>
    %61 = vector.broadcast %58 : vector<1x256xf32> to vector<8x256xf32>
    %62 = arith.addf %60, %61 : vector<8x256xf32>
    %cst_27 = arith.constant 0.000000e+00 : f32
    %63 = vector.broadcast %cst_27 : f32 to vector<8x256xf32>
    %64 = arith.maximumf %62, %63 : vector<8x256xf32>
    %c3 = arith.constant 3 : index
    %c0_28 = arith.constant 0 : index
    %65 = vector.load %arg4[%c3, %c0_28] : memref<5x256xf32, #tpu.memory_space<vmem>>, vector<1x256xf32>
    %cst_29 = arith.constant dense<0.000000e+00> : vector<1x8xf32>
    %66 = tpu.matmul %65, %64, %cst_29 {dimension_numbers = #tpu.dot_dimension_numbers<[1], [1], [0], [0], [0, 0, 1, 0], [], []>} : vector<1x256xf32>, vector<8x256xf32>, vector<1x8xf32> -> vector<1x8xf32>
    %c4 = arith.constant 4 : index
    %c0_30 = arith.constant 0 : index
    %67 = vector.load %arg4[%c4, %c0_30] : memref<5x256xf32, #tpu.memory_space<vmem>>, vector<1x1xf32>
    %68 = vector.broadcast %67 : vector<1x1xf32> to vector<1x8xf32>
    %69 = arith.addf %66, %68 : vector<1x8xf32>
    %c0_31 = arith.constant 0 : index
    %c0_32 = arith.constant 0 : index
    %70 = vector.load %arg5[%c0_31, %c0_32] : memref<1x8xf32, #tpu.memory_space<vmem>>, vector<1x8xf32>
    tpu.vector_store %arg5[%c0_31, %c0_32], %69 {strides = array<i32>} : memref<1x8xf32, #tpu.memory_space<vmem>>, vector<1x8xf32>,
    return
  }
}

</mosaic_0001>

<bundles_post_ra>
// kernel: tpu_custom_call.1
= control target key start
LH: loop header
LB: loop body
LE: loop exit
PB: predicated region body
PF: predicated region fallthrough
CT: control target
= control target key end

     0   :  { %10 = vsyncpa [#allocation3], 0  ;;  %s810_s0 = inlined_call_operand.hbm [shape: f32[8,7], index: 0, kind: input, shape index: {}]   ;;  %s811_s1 = inlined_call_operand.hbm [shape: f32[7,64], index: 1, kind: input, shape index: {}]   ;;  %s812_s2 = inlined_call_operand.vmem [shape: f32[3,64], index: 2, kind: input, shape index: {}]   ;;  %s813_s3 = inlined_call_operand.hbm [shape: f32[64,256], index: 3, kind: input, shape index: {}]   ;;  %s814_s4 = inlined_call_operand.hbm [shape: f32[5,256], index: 4, kind: input, shape index: {}]   ;;  %s815_s5 = inlined_call_operand.hbm [shape: f32[1,8], index: 5, kind: output, shape index: {}]  }
   0x1   :  { %11 = vsyncpa [#allocation6], 0 }
   0x2   :  { %12 = vsyncpa [#allocation9], 0 }
   0x3   :  { %13 = vsyncpa [#allocation4], 0  ;;  %s674_s18 = smov [#allocation5]   ;;  %s675_s20 = smov [#allocation2]  }
   0x4   :  { %s30_s19 = sshll.u32 %s674_s18, 4  ;;  %s20_s21 = sshll.u32 %s675_s20, 4  ;;  %s31_s19 = int_to_ptr.vmem [resolvable:$true] %s30_s19  ;;  %s21_s21 = int_to_ptr.vmem [resolvable:$true] %s20_s21 }
   0x5   :  { %s556_s24 = scalar_lea.hbm %s811_s1, 128 }
   0x6   :  { %p557_p0 = scmp.ne.s32.totalorder %s811_s1, %s556_s24  ;;  %p560_p1 = scmp.lt.u32.totalorder %s556_s24, %s811_s1 }
   0x8   :  { %p562_p2 = pnand %p560_p1, %p557_p0 }
   0xa   :  { %565 = shalt.err (!%p562_p2)
}
   0xb   :  { %s566_s29 = scalar_lea.vmem %s31_s19, 128  ;;  %p571_p4 = scmp.lt.s32.totalorder %s31_s19, %s31_s19 }
   0xc   :  { %p567_p3 = scmp.ne.s32.totalorder %s31_s19, %s566_s29  ;;  %p572_p5 = scmp.lt.s32.totalorder %s566_s29, %s566_s29 }
   0xe   :  { %p573_p6 = por %p572_p5, %p571_p4 }
  0x10   :  { %p574_p7 = pnand %p573_p6, %p567_p3 }
  0x12   :  { %577 = shalt.err (!%p574_p7)
}
  0x13   :  { %33 = dma.hbm_to_vmem [thread:$0]  %s811_s1, 128, %s31_s19, [#allocation6]  }
  0x14   :  { %s578_s9 = scalar_lea.hbm %s810_s0, 128 }
  0x15   :  { %p579_p8 = scmp.ne.s32.totalorder %s810_s0, %s578_s9  ;;  %p582_p9 = scmp.lt.u32.totalorder %s578_s9, %s810_s0 }
  0x17   :  { %p584_p10 = pnand %p582_p9, %p579_p8 }
  0x19   :  { %587 = shalt.err (!%p584_p10)
}
  0x1a   :  { %s588_s14 = scalar_lea.vmem %s21_s21, 128  ;;  %p593_p12 = scmp.lt.s32.totalorder %s21_s21, %s21_s21 }
  0x1b   :  { %p589_p11 = scmp.ne.s32.totalorder %s21_s21, %s588_s14  ;;  %p594_p13 = scmp.lt.s32.totalorder %s588_s14, %s588_s14 }
  0x1d   :  { %p595_p0 = por %p594_p13, %p593_p12 }
  0x1f   :  { %p596_p1 = pnand %p595_p0, %p589_p11 }
  0x21   :  { %599 = shalt.err (!%p596_p1)
}
  0x22   :  { %23 = dma.hbm_to_vmem [thread:$0]  %s810_s0, 128, %s21_s21, [#allocation3]  }
  0x23   :  { %s676_s16 = smov [#allocation7]   ;;  %s600_s20 = scalar_lea.hbm %s813_s3, 2048 }
  0x24   :  { %s41_s17 = sshll.u32 %s676_s16, 4  ;;  %p601_p2 = scmp.ne.s32.totalorder %s813_s3, %s600_s20  ;;  %s42_s17 = int_to_ptr.vmem [resolvable:$true] %s41_s17 }
  0x25   :  { %p604_p3 = scmp.lt.u32.totalorder %s600_s20, %s813_s3 }
  0x27   :  { %p606_p4 = pnand %p604_p3, %p601_p2 }
  0x29   :  { %609 = shalt.err (!%p606_p4)
}
  0x2a   :  { %s610_s26 = scalar_lea.vmem %s42_s17, 2048  ;;  %p615_p6 = scmp.lt.s32.totalorder %s42_s17, %s42_s17 }
  0x2b   :  { %p611_p5 = scmp.ne.s32.totalorder %s42_s17, %s610_s26  ;;  %p616_p7 = scmp.lt.s32.totalorder %s610_s26, %s610_s26 }
  0x2d   :  { %p617_p8 = por %p616_p7, %p615_p6 }
  0x2f   :  { %p618_p9 = pnand %p617_p8, %p611_p5 }
  0x31   :  { %621 = shalt.err (!%p618_p9)
}
  0x32   :  { %s677_s0 = smov 256   ;;  %s678_s21 = smov 16  }
  0x33   :  { %47 = dma.hbm_to_vmem [thread:$0]  %s813_s3, 2048, %s42_s17, [#allocation6], %s677_s0, %s677_s0, %s678_s21  }
  0x34   :  { %s679_s29 = smov [#allocation8]   ;;  %s622_s8 = scalar_lea.hbm %s814_s4, 256 }
  0x35   :  { %s54_s30 = sshll.u32 %s679_s29, 4  ;;  %p623_p10 = scmp.ne.s32.totalorder %s814_s4, %s622_s8  ;;  %s55_s30 = int_to_ptr.vmem [resolvable:$true] %s54_s30 }
  0x36   :  { %p626_p11 = scmp.lt.u32.totalorder %s622_s8, %s814_s4 }
  0x38   :  { %p628_p12 = pnand %p626_p11, %p623_p10 }
  0x3a   :  { %631 = shalt.err (!%p628_p12)
}
  0x3b   :  { %s632_s13 = scalar_lea.vmem %s55_s30, 256  ;;  %p637_p0 = scmp.lt.s32.totalorder %s55_s30, %s55_s30 }
  0x3c   :  { %p633_p13 = scmp.ne.s32.totalorder %s55_s30, %s632_s13  ;;  %p638_p1 = scmp.lt.s32.totalorder %s632_s13, %s632_s13 }
  0x3e   :  { %p639_p2 = por %p638_p1, %p637_p0 }
  0x40   :  { %p640_p3 = pnand %p639_p2, %p633_p13 }
  0x42   :  { %643 = shalt.err (!%p640_p3)
}
  0x43   :  { %57 = dma.hbm_to_vmem [thread:$0]  %s814_s4, 256, %s55_s30, [#allocation9]  }
  0x44   :  { %666 = dma.done.wait [#allocation3], 128  }
  0x45   :  { %667 = vsyncadd [#allocation3], 4294967168 }
  0x46   :  { %668 = dma.done.wait [#allocation6], 2176  }
  0x47   :  { %669 = vsyncadd [#allocation6], 4294965120 }
  0x48   :  { %670 = dma.done.wait [#allocation9], 256  }
  0x49   :  { %671 = vsyncadd [#allocation9], 4294967040  ;;  %v680_v0 = vmov 0.0   ;;  %vm681_vm0 = vmmov 0   ;;  %vm81_vm1 = vcmask 1046528   ;;  %vm77_vm2 = vcmask 56320  }
  0x4a   :  { %517 = vmatprep.subr.mxu0 %v680_v0  ;;  %519 = vmatprep.mubr.msk.f32.mxu0 %vm681_vm0, %v680_v0  ;;  %v71_v1 = vld [vmem:[#allocation5] sm:$0x7f]  ;;  %v70_v2 = vld [vmem:[#allocation2] sm:$0xff]  ;;  %v194_v3 = vld [vmem:[#allocation7 + $0x8] sm:$0xff]  ;;  %vm155_vm3 = vcmask 523264   ;;  %v182_v50 = vlaneseq  ;;  %vm492_vm4 = vcmask 57344  }
  0x4b   :  { %288 = vmatprep.mubr.f32.mxu1 %v680_v0  ;;  %518 = vmatpush3.msk.msra.mxu0 %vm81_vm1, %v71_v1  ;;  %v196_v4 = vld [vmem:[#allocation7 + $0x18] sm:$0xff]  ;;  %v193_v5 = vld [vmem:[#allocation7] sm:$0xff]  ;;  %v195_v7 = vld [vmem:[#allocation7 + $0x10] sm:$0xff] }
  0x4c   :  { %520 = vmatmul.mubr.msk.f32.vlgmr.msra.gmra.mrb[0].mxu0 %vm77_vm2, %v70_v2  ;;  %v522_v6 = vpack.c.bf16 %v196_v4, %v194_v3  ;;  %v198_v8 = vld [vmem:[#allocation7 + $0x28] sm:$0xff]  ;;  %v200_v9 = vld [vmem:[#allocation7 + $0x38] sm:$0xff]  ;;  %v524_v10 = vpack.c.bf16 %v195_v7, %v193_v5  ;;  %v197_v12 = vld [vmem:[#allocation7 + $0x20] sm:$0xff]  ;;  %v768_v51 = vshrl.u32 %v182_v50, 7  ;;  %v682_v4 = vmov 0  }
  0x4d   :  { %v526_v11 = vpack.c.bf16 %v200_v9, %v198_v8  ;;  %v199_v13 = vld [vmem:[#allocation7 + $0x30] sm:$0xff]  ;;  %v202_v14 = vld [vmem:[#allocation7 + $0x48] sm:$0xff]  ;;  %v204_v15 = vld [vmem:[#allocation7 + $0x58] sm:$0xff]  ;;  %549 = vset.pattern.permute.xlu0 %v682_v4 }
  0x4e   :  { %523 = vmatprep.subr.bf16.mxu1 %v522_v6  ;;  %v528_v16 = vpack.c.bf16 %v199_v13, %v197_v12  ;;  %v530_v17 = vpack.c.bf16 %v204_v15, %v202_v14  ;;  %v201_v18 = vld [vmem:[#allocation7 + $0x40] sm:$0xff]  ;;  %v203_v19 = vld [vmem:[#allocation7 + $0x50] sm:$0xff]  ;;  %v206_v20 = vld [vmem:[#allocation7 + $0x68] sm:$0xff]  ;;  %v774_v53 = vsub.s32 0, %v768_v51  ;;  %v783_v0 = vsub.s32 1, %v768_v51 }
  0x4f   :  { %525 = vmatpush1.bf16.msra.mxu1 %v524_v10  ;;  %v208_v21 = vld [vmem:[#allocation7 + $0x78] sm:$0xff]  ;;  %v532_v22 = vpack.c.bf16 %v203_v19, %v201_v18  ;;  %v205_v24 = vld [vmem:[#allocation7 + $0x60] sm:$0xff]  ;;  %v207_v25 = vld [vmem:[#allocation7 + $0x70] sm:$0xff] }
  0x50   :  { %527 = vmatprep.subr.bf16.mxu1 %v526_v11  ;;  %v534_v23 = vpack.c.bf16 %v208_v21, %v206_v20  ;;  %v536_v26 = vpack.c.bf16 %v207_v25, %v205_v24  ;;  %v511_v27 = vld [vmem:[%s812_s2] ss:$0 sm:$0xff]  ;;  %v175_v52 = vld [vmem:[%s812_s2 + $0x1] sm:$0x1]  ;;  %v179_v56 = vld [vmem:[%s812_s2 + $0x2] sm:$0x1] }
  0x51   :  { %v785_v1 = vld [vmem:[#allocation8 + $0x3] ss:$8 sm:$0x3]  ;;  %v405_v3 = vld [vmem:[#allocation8 + $0x4] ss:$0 sm:$0xff]  ;;  %s684_s2 = smov [#allocation10]  }
  0x52   :  { %v419_v2 = vrot.slane %v785_v1, %v783_v0  ;;  %408 = vperm.xlu0 %549, %v405_v3   ;;  %v209_v5 = vld [vmem:[#allocation8] ss:$8 sm:$0x3]  ;;  %s500_s19 = sshll.u32 %s684_s2, 4  ;;  %s501_s19 = int_to_ptr.vmem [resolvable:$true] %s500_s19 }
  0x53   :  { %529 = vmatpush1.bf16.msra.mxu1 %v528_v16  ;;  %v214_v6 = vrot.slane %v209_v5, %v774_v53  ;;  %v218_v7 = vrot.slane %v209_v5, %v783_v0  ;;  %v353_v5 = vld [vmem:[#allocation8 + $0x2] ss:$8 sm:$0x3]  ;;  %s644_s20 = scalar_lea.vmem %s501_s19, 16  ;;  %s648_s22 = scalar_lea.vmem %s501_s19, 32 }
  0x54   :  { %531 = vmatprep.subr.bf16.mxu1 %v530_v17  ;;  %486 = vmatprep.mubr.f32.mxu0 %v419_v2  ;;  %p645_p4 = scmp.ne.s32.totalorder %s501_s19, %s644_s20  ;;  %p649_p5 = scmp.lt.s32.totalorder %s501_s19, %s501_s19 }
  0x55   :  { %p650_p6 = scmp.lt.s32.totalorder %s648_s22, %s644_s20 }
  0x57   :  { %533 = vmatpush1.bf16.msra.mxu1 %v532_v22  ;;  %p651_p7 = por %p650_p6, %p649_p5 }
  0x58   :  { %535 = vmatprep.subr.bf16.mxu1 %v534_v23 }
  0x59   :  { %p652_p8 = pnand %p651_p7, %p645_p4 }
  0x5b   :  { %537 = vmatpush1.bf16.msra.mxu1 %v536_v26 }
 0x11f   :  { %v151_v28 = vpop.f32.mrb[0].mxu0 }
 0x120   :  { %v152_v29 = vadd.f32 %v511_v27, %v151_v28  ;;  %v521_v30 = vpop.f32.mrb[1].mxu0 }
 0x122   :  { %v156_v31 = vsel %vm155_vm3, %v152_v29, 0.0 }
 0x123   :  { %v157_v32 = vrot.slane %v156_v31, 4 }
 0x125   :  { %v158_v33 = vadd.f32 %v157_v32, %v156_v31 }
 0x127   :  { %v159_v34 = vrot.slane %v158_v33, 2 }
 0x129   :  { %v160_v35 = vadd.f32 %v159_v34, %v158_v33 }
 0x12b   :  { %v161_v36 = vrot.slane %v160_v35, 1 }
 0x12d   :  { %v162_v37 = vadd.f32 %v161_v36, %v160_v35 }
 0x12f   :  { %v164_v38 = vmul.f32 0.125, %v162_v37 }
 0x131   :  { %v165_v39 = vsub.f32 %v152_v29, %v164_v38 }
 0x133   :  { %v166_v40 = vmul.f32 %v165_v39, %v165_v39 }
 0x135   :  { %v167_v41 = vsel %vm155_vm3, %v166_v40, 0.0 }
 0x136   :  { %v168_v42 = vrot.slane %v167_v41, 4 }
 0x138   :  { %v169_v43 = vadd.f32 %v168_v42, %v167_v41 }
 0x13a   :  { %v170_v44 = vrot.slane %v169_v43, 2 }
 0x13c   :  { %v171_v45 = vadd.f32 %v170_v44, %v169_v43 }
 0x13e   :  { %v172_v46 = vrot.slane %v171_v45, 1 }
 0x140   :  { %v173_v47 = vadd.f32 %v172_v46, %v171_v45  ;;  %v683_v46 = vmov 1966171168  }
 0x142   :  { %v174_v48 = vmul.f32 0.125, %v173_v47  ;;  %v337_v47 = vunpack.c.l.s4 %v683_v46 }
 0x144   :  { %v176_v49 = vadd.f32 1e-05, %v174_v48  ;;  %v338_v48 = vunpack.c.0.s8 %v337_v47 }
 0x146   :  { %550 = vrsqrt.f32 %v176_v49  ;;  %v341_v50 = vsub.s32 %v338_v48, %v768_v51 }
 0x150   :  { %v551_v54 = vpop.eup %550 }
 0x151   :  { %v178_v55 = vmul.f32 %v551_v54, %v175_v52 }
 0x153   :  { %v180_v57 = vmul.f32 %v178_v55, %v164_v38  ;;  %v185_v58 = vrot.slane %v178_v55, %v774_v53 }
 0x155   :  { %v181_v59 = vsub.f32 %v179_v56, %v180_v57  ;;  %v186_v60 = vmul.f32 %v185_v58, %v152_v29  ;;  %v328_v56 = vld [vmem:[#allocation8 + $0x1] ss:$8 sm:$0x3] }
 0x157   :  { %v190_v61 = vrot.slane %v181_v59, %v774_v53 }
 0x159   :  { %v191_v62 = vadd.f32 %v190_v61, %v186_v60 }
 0x15b   :  { %v192_v63 = vmax.f32 %v191_v62, 0.0 }
 0x15d   :  { %514 = vmatmul.mubr.msk.f32.vlgmr.msra.gmra.mrb[0].mxu1 %vm155_vm3, %v192_v63 }
 0x230   :  { %v290_v8 = vpop.f32.mrb[0].mxu1 }
 0x231   :  { %v291_v9 = vadd.f32 %v290_v8, %v214_v6  ;;  %v292_v10 = vpop.f32.mrb[1].mxu1 }
 0x232   :  { %v293_v11 = vadd.f32 %v292_v10, %v218_v7 }
 0x233   :  { %v295_v12 = vrot.slane %v291_v9, 4 }
 0x234   :  { %v301_v13 = vrot.slane %v293_v11, 4 }
 0x235   :  { %v296_v14 = vadd.f32 %v295_v12, %v291_v9 }
 0x236   :  { %v302_v15 = vadd.f32 %v301_v13, %v293_v11 }
 0x237   :  { %v297_v16 = vrot.slane %v296_v14, 2 }
 0x238   :  { %v303_v17 = vrot.slane %v302_v15, 2 }
 0x239   :  { %v298_v18 = vadd.f32 %v297_v16, %v296_v14 }
 0x23a   :  { %v304_v19 = vadd.f32 %v303_v17, %v302_v15  ;;  %v415_v15 = vrot.slane %v785_v1, %v774_v53 }
 0x23b   :  { %v299_v20 = vrot.slane %v298_v18, 1 }
 0x23c   :  { %v305_v21 = vrot.slane %v304_v19, 1 }
 0x23d   :  { %v300_v22 = vadd.f32 %v299_v20, %v298_v18 }
 0x23e   :  { %v306_v23 = vadd.f32 %v305_v21, %v304_v19 }
 0x23f   :  { %v307_v24 = vmul.f32 0.125, %v300_v22 }
 0x240   :  { %v308_v25 = vmul.f32 0.125, %v306_v23 }
 0x241   :  { %v309_v26 = vsub.f32 %v291_v9, %v307_v24 }
 0x242   :  { %v310_v27 = vsub.f32 %v293_v11, %v308_v25 }
 0x243   :  { %v311_v28 = vmul.f32 %v309_v26, %v309_v26 }
 0x244   :  { %v312_v29 = vmul.f32 %v310_v27, %v310_v27 }
 0x245   :  { %v313_v30 = vrot.slane %v311_v28, 4 }
 0x246   :  { %v319_v31 = vrot.slane %v312_v29, 4 }
 0x247   :  { %v314_v32 = vadd.f32 %v313_v30, %v311_v28 }
 0x248   :  { %v320_v33 = vadd.f32 %v319_v31, %v312_v29 }
 0x249   :  { %v315_v34 = vrot.slane %v314_v32, 2 }
 0x24a   :  { %v321_v35 = vrot.slane %v320_v33, 2 }
 0x24b   :  { %v316_v36 = vadd.f32 %v315_v34, %v314_v32 }
 0x24c   :  { %v322_v37 = vadd.f32 %v321_v35, %v320_v33 }
 0x24d   :  { %v317_v38 = vrot.slane %v316_v36, 1 }
 0x24e   :  { %v323_v39 = vrot.slane %v322_v37, 1 }
 0x24f   :  { %v318_v40 = vadd.f32 %v317_v38, %v316_v36 }
 0x250   :  { %v324_v41 = vadd.f32 %v323_v39, %v322_v37 }
 0x251   :  { %v325_v42 = vmul.f32 0.125, %v318_v40 }
 0x252   :  { %v326_v43 = vmul.f32 0.125, %v324_v41 }
 0x253   :  { %v329_v44 = vadd.f32 1e-05, %v325_v42 }
 0x254   :  { %v330_v45 = vadd.f32 1e-05, %v326_v43 }
 0x255   :  { %552 = vrsqrt.f32 %v329_v44 }
 0x256   :  { %554 = vrsqrt.f32 %v330_v45 }
 0x25f   :  { %v553_v49 = vpop.eup %552 }
 0x260   :  { %v555_v52 = vpop.eup %554 }
 0x261   :  { %v335_v54 = vcombine.low %v553_v49, %v555_v52 }
 0x263   :  { %v342_v55 = vrot.slane %v335_v54, %v341_v50 }
 0x265   :  { %v349_v57 = vrot.slane %v342_v55, %v341_v50 }
 0x267   :  { %v351_v58 = vmul.f32 %v349_v57, %v328_v56 }
 0x269   :  { %v358_v59 = vrot.slane %v351_v58, %v774_v53  ;;  %v362_v60 = vrot.slane %v351_v58, %v783_v0 }
 0x26b   :  { %v365_v61 = vmul.f32 %v358_v59, %v307_v24  ;;  %v366_v62 = vmul.f32 %v362_v60, %v308_v25  ;;  %v387_v63 = vmul.f32 %v362_v60, %v293_v11  ;;  %v386_v2 = vmul.f32 %v358_v59, %v291_v9  ;;  %v409_v9 = vpop.permute.xlu0 %408 }
 0x26d   :  { %v369_v3 = vcombine.low %v365_v61, %v366_v62 }
 0x26f   :  { %v376_v4 = vrot.slane %v369_v3, %v341_v50 }
 0x271   :  { %v383_v6 = vrot.slane %v376_v4, %v341_v50 }
 0x273   :  { %v385_v7 = vsub.f32 %v353_v5, %v383_v6 }
 0x275   :  { %v396_v51 = vrot.slane %v385_v7, %v783_v0  ;;  %v392_v8 = vrot.slane %v385_v7, %v774_v53 }
 0x277   :  { %v400_v10 = vadd.f32 %v396_v51, %v387_v63  ;;  %v399_v12 = vadd.f32 %v392_v8, %v386_v2 }
 0x279   :  { %v402_v13 = vmax.f32 %v400_v10, 0.0  ;;  %v401_v14 = vmax.f32 %v399_v12, 0.0 }
 0x27b   :  { %422 = vmatprep.subr.mxu0 %v402_v13 }
 0x27c   :  { %423 = vmatpush1.xpose.msra.mxu0 %v401_v14 }
 0x27f   :  { %487 = vmatmul.mubr.f32.vlgmr.msra.gmra.mrb[2].mxu0 %v415_v15 }
 0x352   :  { %v488_v11 = vpop.f32.mrb[2].mxu0 }
 0x353   :  { %v489_v16 = vadd.f32 %v488_v11, %v409_v9  ;;  %v490_v17 = vpop.f32.mrb[3].mxu0 }
 0x355   :  { %493 = vst.msk [vmem:[#allocation10] sm:$0x1] %vm492_vm4, %v489_v16 }
 0x356   :  { %655 = shalt.err (!%p652_p8)
}
 0x357   :  { %s656_s25 = scalar_lea.hbm %s815_s5, 16 }
 0x358   :  { %p657_p9 = scmp.ne.s32.totalorder %s815_s5, %s656_s25  ;;  %p660_p10 = scmp.lt.u32.totalorder %s656_s25, %s815_s5 }
 0x35a   :  { %p662_p11 = pnand %p660_p10, %p657_p9 }
 0x35c   :  { %665 = shalt.err (!%p662_p11)
}
 0x35d   :  { %503 = dma.vmem_to_hbm [thread:$0]  %s501_s19, 16, %s815_s5, [#allocation4]  }
 0x35e   :  { %672 = dma.done.wait [#allocation4], 16  }
 0x35f   :  { %673 = vsyncadd [#allocation4], 4294967280 }
 0x360   :  { %507 = vsyncpa [#allocation3], 1 }
 0x361   :  { %508 = vsyncpa [#allocation6], 1 }
 0x362   :  { %509 = vsyncpa [#allocation9], 1 }
 0x363   :  { %510 = vsyncpa [#allocation4], 1 }

</bundles_post_ra>
